<compile_context>
chip_gen: v7x
topology: tpu7x:2x2x1
jax: 0.10.0
libtpu: 0.0.40
codegen_flags: <defaults>
</compile_context>

<pallas_src>
import functools
import math

import jax
import jax.numpy as jnp
from jax.experimental import pallas as pl
from jax.experimental.pallas import tpu as pltpu


def _freq_bands(n_freqs: int, log_space: bool):
    """Frequency bands matching the PyTorch __init__ (to f32 rounding)."""
    if n_freqs <= 0:
        return ()
    if log_space:
        return tuple(2.0 ** k for k in range(n_freqs))
    if n_freqs == 1:
        return (1.0,)
    step = (2.0 ** (n_freqs - 1) - 1.0) / (n_freqs - 1)
    return tuple(1.0 + k * step for k in range(n_freqs))


def _vmem_budget():
    """(per-step block byte budget, vmem_limit_bytes) per TPU generation."""
    cap = 0
    try:
        info = pltpu.get_tpu_info()
        for name in ("vmem_capacity_bytes", "vmem_bytes", "vmem_size_bytes"):
            v = getattr(info, name, None)
            if v:
                cap = int(v)
                break
    except Exception:
        cap = 0
    if cap >= (100 << 20):            # v5e / v6e: 128 MiB physical VMEM
        return 24 << 20, 64 << 20
    # v7x (64 MiB per TensorCore, both cores resident) or unknown: stay small.
    return 12 << 20, 32 << 20


def _pos_enc_kernel(x_ref, o_ref, *, freqs, delta, log_space, use_recurrence,
                    reseed_every):
    """x_ref: (tile_r, lane) input tile.  o_ref: (P, tile_r, lane) planar out."""
    out_dt = o_ref.dtype
    x = x_ref[...]
    if x.dtype != jnp.float32:
        x = x.astype(jnp.float32)       # bf16 phases too coarse: compute in f32
    o_ref[0] = x.astype(out_dt)         # identity plane

    n_freqs = len(freqs)
    if n_freqs == 0:
        return

    if not use_recurrence:
        for k, f in enumerate(freqs):   # static Python floats -> unrolled
            xf = x * f
            o_ref[1 + 2 * k] = jnp.sin(xf).astype(out_dt)
            o_ref[2 + 2 * k] = jnp.cos(xf).astype(out_dt)
        return

    # Recurrence path: only every `reseed_every`-th band pays the full sin/cos
    # polynomials; the rest cost ~6 VALU ops each.
    sd = cd = None
    s = c = None
    for k, f in enumerate(freqs):
        if s is None or (k % reseed_every) == 0:
            xf = x * f                  # direct (re-)seed: exact band
            s, c = jnp.sin(xf), jnp.cos(xf)
        elif log_space:
            # f_k = 2 * f_{k-1}: double-angle identities on the VPU.
            s, c = 2.0 * s * c, 1.0 - 2.0 * s * s
        else:
            # f_k = f_{k-1} + delta: angle-addition identities on the VPU.
            if sd is None:
                xd = x * delta
                sd, cd = jnp.sin(xd), jnp.cos(xd)
            s, c = s * cd + c * sd, c * cd - s * sd
        o_ref[1 + 2 * k] = s.astype(out_dt)
        o_ref[2 + 2 * k] = c.astype(out_dt)


def positional_encoder(x, n_freqs: int, log_space: bool = False, *,
                       planar_output: bool = False, out_dtype=None,
                       use_recurrence: bool = True, reseed_every: int = 4,
                       max_tile_rows=None):
    """JAX/Pallas equivalent of PositionalEncoder.forward.

    Default output matches PyTorch: (..., d_input*(1+2*n_freqs)) with the last
    axis ordered [x | sin(f0 x) | cos(f0 x) | sin(f1 x) | ...].
    planar_output=True instead returns the transpose-free (P, *x.shape) slab
    with out[0]=x, out[1+2k]=sin(f_k x), out[2+2k]=cos(f_k x).
    """
    orig_shape = x.shape
    d_input = orig_shape[-1]
    n_planes = 1 + 2 * n_freqs
    in_dtype = jnp.dtype(x.dtype)
    out_dtype = jnp.dtype(out_dtype) if out_dtype is not None else in_dtype

    freqs = _freq_bands(n_freqs, log_space)
    delta = (freqs[1] - freqs[0]) if len(freqs) > 1 else 0.0

    # ---- lane-dense flat view (pad only to a multiple of `lane`) -------------
    total = math.prod(orig_shape)
    lane = next((l for l in (512, 256, 128) if total % l == 0), 128)
    rows = pl.cdiv(total, lane)
    pad = rows * lane - total

    x_flat = x.reshape(-1)
    if pad:
        x_flat = jnp.pad(x_flat, (0, pad))   # <= lane-1 elems; skipped if aligned
    x2 = x_flat.reshape(rows, lane)

    # ---- row tile: biggest double-buffered block inside the VMEM budget ------
    budget, vmem_limit = _vmem_budget()
    sub = max(32 // in_dtype.itemsize, 32 // out_dtype.itemsize)  # dtype-aware
    bytes_per_row = 2 * lane * (in_dtype.itemsize + n_planes * out_dtype.itemsize)
    tile_r = max(sub, (budget // bytes_per_row) // sub * sub)
    if max_tile_rows is not None:
        tile_r = max(sub, min(tile_r, (max_tile_rows // sub) * sub))
    if rows <= sub:
        tile_r = rows                         # full-dim block (always legal)
    else:
        tile_r = min(tile_r, (rows // sub) * sub)
        half = ((rows + 1) // 2 // sub) * sub  # >=2 grid steps -> v7x megacore
        if half >= sub:
            tile_r = min(tile_r, half)

    grid = (pl.cdiv(rows, tile_r),)

    kernel = functools.partial(
        _pos_enc_kernel, freqs=freqs, delta=delta, log_space=log_space,
        use_recurrence=(use_recurrence and n_freqs > 0),
        reseed_every=max(1, reseed_every))

    out_planes = pl.pallas_call(
        kernel,
        out_shape=jax.ShapeDtypeStruct((n_planes, rows, lane), out_dtype),
        grid=grid,
        in_specs=[pl.BlockSpec((tile_r, lane), lambda i: (i, 0))],
        out_specs=pl.BlockSpec((n_planes, tile_r, lane), lambda i: (0, i, 0)),
        compiler_params=pltpu.CompilerParams(
            dimension_semantics=("parallel",),
            vmem_limit_bytes=vmem_limit),
    )(x2)

    # ---- back to the logical shape -------------------------------------------
    flat = out_planes.reshape(n_planes, rows * lane)
    if pad:
        flat = flat[:, :total]
    if planar_output:
        return flat.reshape((n_planes,) + orig_shape)

    # PyTorch-identical interleave: one extra read+write pass over the P-fold
    # output.  Prefer planar_output=True when the consumer can absorb it.
    n_points = total // d_input
    planar_c = flat.reshape(n_planes, n_points, d_input)
    inter = jnp.swapaxes(planar_c, 0, 1)          # (N, P, d)
    return inter.reshape(orig_shape[:-1] + (n_planes * d_input,))


def _reference(x, n_freqs: int, log_space: bool = False):
    """Pure-JAX reference mirroring the PyTorch forward."""
    parts = [x]
    for f in _freq_bands(n_freqs, log_space):
        parts.append(jnp.sin(x * f))
        parts.append(jnp.cos(x * f))
    return jnp.concatenate(parts, axis=-1)


if __name__ == "__main__":
    key = jax.random.PRNGKey(0)
    k1, k2 = jax.random.split(key)

    # Small shapes consistent with the module: rays x samples x d_input=3.
    F = 4
    x1 = jax.random.normal(k1, (2, 64, 3), dtype=jnp.float32)  # 128 pts, lane-aligned

    # 1) Default path (linear bands, angle-addition recurrence, interleaved).
    out = jax.block_until_ready(positional_encoder(x1, F, log_space=False))
    ref = _reference(x1, F, log_space=False)
    assert out.shape == (2, 64, 3 * (1 + 2 * F))
    assert jnp.allclose(out, ref, atol=1e-4, rtol=1e-4), "linear/recurrence mismatch"

    # 2) Exact direct-evaluation path.
    out_exact = positional_encoder(x1, F, log_space=False, use_recurrence=False)
    assert jnp.allclose(out_exact, ref, atol=1e-5, rtol=1e-5), "exact path mismatch"

    # 3) Log-space (power-of-two) bands via double-angle recurrence.
    out_log = positional_encoder(x1, F, log_space=True)
    ref_log = _reference(x1, F, log_space=True)
    assert jnp.allclose(out_log, ref_log, atol=1e-4, rtol=1e-4), "log-space mismatch"

    # 4) Planar (transpose-free) output layout.
    out_pl = positional_encoder(x1, F, log_space=False, planar_output=True)
    assert out_pl.shape == (1 + 2 * F, 2, 64, 3)
    assert jnp.allclose(jnp.moveaxis(out_pl, 0, -2).reshape(ref.shape), ref,
                        atol=1e-4, rtol=1e-4), "planar layout mismatch"

    # 5) Ragged / padded multi-step grid (small input, forced small tiles).
    x_r = jax.random.normal(k2, (1100, 3), dtype=jnp.float32)
    out_r = positional_encoder(x_r, F, log_space=False, max_tile_rows=8)
    assert jnp.allclose(out_r, _reference(x_r, F, False), atol=1e-4, rtol=1e-4), \
        "ragged-grid mismatch"

    # 6) Narrow output dtype (compute in f32, store bf16).
    out_bf = positional_encoder(x1, F, log_space=False, out_dtype=jnp.bfloat16)
    assert out_bf.dtype == jnp.bfloat16
    assert jnp.allclose(out_bf.astype(jnp.float32), ref, atol=3e-2, rtol=3e-2), \
        "bf16 output mismatch"

    jax.block_until_ready((out, out_exact, out_log, out_pl, out_r, out_bf))
    print("KERNEL_OK")
</pallas_src>

<mosaic_0001>
module attributes {stable_mosaic.version = 11 : i64} {
  func.func @_pos_enc_kernel(%arg0: i32, %arg1: memref<3x128xf32, #tpu.memory_space<vmem>>, %arg2: memref<9x3x128xf32, #tpu.memory_space<vmem>>) attributes {dimension_semantics = [#tpu.dimension_semantics<parallel>], iteration_bounds = array<i64: 1>, scalar_prefetch = 0 : i64, scratch_operands = 0 : i64, tpu.core_type = #tpu.core_type<tc>, window_params = [{transform_indices = @transform_0, window_bounds = array<i64: 3, 128>}, {transform_indices = @transform_1, window_bounds = array<i64: 9, 3, 128>}]} {
    %c0 = arith.constant 0 : index
    %c0_0 = arith.constant 0 : index
    %0 = vector.load %arg1[%c0, %c0_0] : memref<3x128xf32, #tpu.memory_space<vmem>>, vector<3x128xf32>
    %c0_1 = arith.constant 0 : index
    %c0_2 = arith.constant 0 : index
    %c0_3 = arith.constant 0 : index
    %1 = vector.load %arg2[%c0_1, %c0_2, %c0_3] : memref<9x3x128xf32, #tpu.memory_space<vmem>>, vector<1x3x128xf32>
    %2 = vector.shape_cast %1 : vector<1x3x128xf32> to vector<3x128xf32>
    %3 = vector.shape_cast %0 : vector<3x128xf32> to vector<1x3x128xf32>
    tpu.vector_store %arg2[%c0_1, %c0_2, %c0_3], %3 {strides = array<i32>} : memref<9x3x128xf32, #tpu.memory_space<vmem>>, vector<1x3x128xf32>,
    %cst = arith.constant 1.000000e+00 : f32
    %4 = vector.broadcast %cst : f32 to vector<3x128xf32>
    %5 = arith.mulf %0, %4 : vector<3x128xf32>
    %6 = math.sin %5 : vector<3x128xf32>
    %7 = math.cos %5 : vector<3x128xf32>
    %c1 = arith.constant 1 : index
    %c0_4 = arith.constant 0 : index
    %c0_5 = arith.constant 0 : index
    %8 = vector.load %arg2[%c1, %c0_4, %c0_5] : memref<9x3x128xf32, #tpu.memory_space<vmem>>, vector<1x3x128xf32>
    %9 = vector.shape_cast %8 : vector<1x3x128xf32> to vector<3x128xf32>
    %10 = vector.shape_cast %6 : vector<3x128xf32> to vector<1x3x128xf32>
    tpu.vector_store %arg2[%c1, %c0_4, %c0_5], %10 {strides = array<i32>} : memref<9x3x128xf32, #tpu.memory_space<vmem>>, vector<1x3x128xf32>,
    %c2 = arith.constant 2 : index
    %c0_6 = arith.constant 0 : index
    %c0_7 = arith.constant 0 : index
    %11 = vector.load %arg2[%c2, %c0_6, %c0_7] : memref<9x3x128xf32, #tpu.memory_space<vmem>>, vector<1x3x128xf32>
    %12 = vector.shape_cast %11 : vector<1x3x128xf32> to vector<3x128xf32>
    %13 = vector.shape_cast %7 : vector<3x128xf32> to vector<1x3x128xf32>
    tpu.vector_store %arg2[%c2, %c0_6, %c0_7], %13 {strides = array<i32>} : memref<9x3x128xf32, #tpu.memory_space<vmem>>, vector<1x3x128xf32>,
    %cst_8 = arith.constant 2.33333325 : f32
    %14 = vector.broadcast %cst_8 : f32 to vector<3x128xf32>
    %15 = arith.mulf %0, %14 : vector<3x128xf32>
    %16 = math.sin %15 : vector<3x128xf32>
    %17 = math.cos %15 : vector<3x128xf32>
    %18 = arith.mulf %6, %17 : vector<3x128xf32>
    %19 = arith.mulf %7, %16 : vector<3x128xf32>
    %20 = arith.addf %18, %19 : vector<3x128xf32>
    %21 = arith.mulf %7, %17 : vector<3x128xf32>
    %22 = arith.mulf %6, %16 : vector<3x128xf32>
    %23 = arith.subf %21, %22 : vector<3x128xf32>
    %c3 = arith.constant 3 : index
    %c0_9 = arith.constant 0 : index
    %c0_10 = arith.constant 0 : index
    %24 = vector.load %arg2[%c3, %c0_9, %c0_10] : memref<9x3x128xf32, #tpu.memory_space<vmem>>, vector<1x3x128xf32>
    %25 = vector.shape_cast %24 : vector<1x3x128xf32> to vector<3x128xf32>
    %26 = vector.shape_cast %20 : vector<3x128xf32> to vector<1x3x128xf32>
    tpu.vector_store %arg2[%c3, %c0_9, %c0_10], %26 {strides = array<i32>} : memref<9x3x128xf32, #tpu.memory_space<vmem>>, vector<1x3x128xf32>,
    %c4 = arith.constant 4 : index
    %c0_11 = arith.constant 0 : index
    %c0_12 = arith.constant 0 : index
    %27 = vector.load %arg2[%c4, %c0_11, %c0_12] : memref<9x3x128xf32, #tpu.memory_space<vmem>>, vector<1x3x128xf32>
    %28 = vector.shape_cast %27 : vector<1x3x128xf32> to vector<3x128xf32>
    %29 = vector.shape_cast %23 : vector<3x128xf32> to vector<1x3x128xf32>
    tpu.vector_store %arg2[%c4, %c0_11, %c0_12], %29 {strides = array<i32>} : memref<9x3x128xf32, #tpu.memory_space<vmem>>, vector<1x3x128xf32>,
    %30 = arith.mulf %20, %17 : vector<3x128xf32>
    %31 = arith.mulf %23, %16 : vector<3x128xf32>
    %32 = arith.addf %30, %31 : vector<3x128xf32>
    %33 = arith.mulf %23, %17 : vector<3x128xf32>
    %34 = arith.mulf %20, %16 : vector<3x128xf32>
    %35 = arith.subf %33, %34 : vector<3x128xf32>
    %c5 = arith.constant 5 : index
    %c0_13 = arith.constant 0 : index
    %c0_14 = arith.constant 0 : index
    %36 = vector.load %arg2[%c5, %c0_13, %c0_14] : memref<9x3x128xf32, #tpu.memory_space<vmem>>, vector<1x3x128xf32>
    %37 = vector.shape_cast %36 : vector<1x3x128xf32> to vector<3x128xf32>
    %38 = vector.shape_cast %32 : vector<3x128xf32> to vector<1x3x128xf32>
    tpu.vector_store %arg2[%c5, %c0_13, %c0_14], %38 {strides = array<i32>} : memref<9x3x128xf32, #tpu.memory_space<vmem>>, vector<1x3x128xf32>,
    %c6 = arith.constant 6 : index
    %c0_15 = arith.constant 0 : index
    %c0_16 = arith.constant 0 : index
    %39 = vector.load %arg2[%c6, %c0_15, %c0_16] : memref<9x3x128xf32, #tpu.memory_space<vmem>>, vector<1x3x128xf32>
    %40 = vector.shape_cast %39 : vector<1x3x128xf32> to vector<3x128xf32>
    %41 = vector.shape_cast %35 : vector<3x128xf32> to vector<1x3x128xf32>
    tpu.vector_store %arg2[%c6, %c0_15, %c0_16], %41 {strides = array<i32>} : memref<9x3x128xf32, #tpu.memory_space<vmem>>, vector<1x3x128xf32>,
    %42 = arith.mulf %32, %17 : vector<3x128xf32>
    %43 = arith.mulf %35, %16 : vector<3x128xf32>
    %44 = arith.addf %42, %43 : vector<3x128xf32>
    %45 = arith.mulf %35, %17 : vector<3x128xf32>
    %46 = arith.mulf %32, %16 : vector<3x128xf32>
    %47 = arith.subf %45, %46 : vector<3x128xf32>
    %c7 = arith.constant 7 : index
    %c0_17 = arith.constant 0 : index
    %c0_18 = arith.constant 0 : index
    %48 = vector.load %arg2[%c7, %c0_17, %c0_18] : memref<9x3x128xf32, #tpu.memory_space<vmem>>, vector<1x3x128xf32>
    %49 = vector.shape_cast %48 : vector<1x3x128xf32> to vector<3x128xf32>
    %50 = vector.shape_cast %44 : vector<3x128xf32> to vector<1x3x128xf32>
    tpu.vector_store %arg2[%c7, %c0_17, %c0_18], %50 {strides = array<i32>} : memref<9x3x128xf32, #tpu.memory_space<vmem>>, vector<1x3x128xf32>,
    %c8 = arith.constant 8 : index
    %c0_19 = arith.constant 0 : index
    %c0_20 = arith.constant 0 : index
    %51 = vector.load %arg2[%c8, %c0_19, %c0_20] : memref<9x3x128xf32, #tpu.memory_space<vmem>>, vector<1x3x128xf32>
    %52 = vector.shape_cast %51 : vector<1x3x128xf32> to vector<3x128xf32>
    %53 = vector.shape_cast %47 : vector<3x128xf32> to vector<1x3x128xf32>
    tpu.vector_store %arg2[%c8, %c0_19, %c0_20], %53 {strides = array<i32>} : memref<9x3x128xf32, #tpu.memory_space<vmem>>, vector<1x3x128xf32>,
    return
  }
  func.func @transform_0(%arg0: i32) -> (i32, i32) {
    %c0_i32 = arith.constant 0 : i32
    %c0_i32_0 = arith.constant 0 : i32
    return %arg0, %c0_i32 : i32, i32
  }
  func.func @transform_1(%arg0: i32) -> (i32, i32, i32) {
    %c0_i32 = arith.constant 0 : i32
    %c0_i32_0 = arith.constant 0 : i32
    %c0_i32_1 = arith.constant 0 : i32
    return %c0_i32, %arg0, %c0_i32_0 : i32, i32, i32
  }
}

</mosaic_0001>

<bundles_post_ra>
// kernel: tpu_custom_call.1
= control target key start
LH: loop header
LB: loop body
LE: loop exit
PB: predicated region body
PF: predicated region fallthrough
CT: control target
= control target key end

     0   :  { %6 = vsyncpa [#allocation3], 0  ;;  %s686_s0 = inlined_call_operand.hbm [shape: f32[3,128], index: 0, kind: input, shape index: {}]   ;;  %s687_s1 = inlined_call_operand.hbm [shape: f32[9,3,128], index: 1, kind: output, shape index: {}]  }
   0x1   :  { %7 = vsyncpa [#allocation4], 0  ;;  %s579_s6 = smov [#allocation2]   ;;  %s531_s10 = scalar_lea.hbm %s686_s0, 64 }
   0x2   :  { %s14_s7 = sshll.u32 %s579_s6, 4  ;;  %p532_p0 = scmp.ne.s32.totalorder %s686_s0, %s531_s10  ;;  %s15_s7 = int_to_ptr.vmem [resolvable:$true] %s14_s7 }
   0x3   :  { %p535_p1 = scmp.lt.u32.totalorder %s531_s10, %s686_s0 }
   0x5   :  { %p537_p2 = pnand %p535_p1, %p532_p0 }
   0x7   :  { %540 = shalt.err (!%p537_p2)
}
   0x8   :  { %s541_s15 = scalar_lea.vmem %s15_s7, 64  ;;  %p546_p4 = scmp.lt.s32.totalorder %s15_s7, %s15_s7 }
   0x9   :  { %p542_p3 = scmp.ne.s32.totalorder %s15_s7, %s541_s15  ;;  %p547_p5 = scmp.lt.s32.totalorder %s541_s15, %s541_s15 }
   0xb   :  { %p548_p6 = por %p547_p5, %p546_p4 }
   0xd   :  { %p549_p7 = pnand %p548_p6, %p542_p3 }
   0xf   :  { %552 = shalt.err (!%p549_p7)
}
  0x10   :  { %17 = dma.hbm_to_vmem [thread:$0]  %s686_s0, 64, %s15_s7, [#allocation3]  }
  0x11   :  { %575 = dma.done.wait [#allocation3], 64  }
  0x12   :  { %576 = vsyncadd [#allocation3], 4294967232  ;;  %v611_v0 = vld [vmem:[#allocation2] sm:$0x7]  ;;  %v580_v23 = vmov 683565275  }
  0x13   :  { %22 = vst [vmem:[#allocation5] sm:$0x7] %v611_v0  ;;  %v26_v1 = vand.u32 2139095040, %v611_v0  ;;  %v616_v2 = vmul.f32 2.3333333, %v611_v0  ;;  %vm25_vm14 = vcmp.lt.s32.totalorder %v611_v0, 0 }
  0x14   :  { %v23_v3 = vand.u32 2147483647, %v611_v0  ;;  %v581_v26 = vmov 2475754826   ;;  %v582_v28 = vmov 2131351028  }
  0x15   :  { %v27_v4 = vshrl.u32 %v26_v1, 23  ;;  %v238_v5 = vand.u32 2139095040, %v616_v2  ;;  %v235_v7 = vand.u32 2147483647, %v616_v2  ;;  %v583_v30 = vmov 2102212464  }
  0x16   :  { %v30_v6 = vand.u32 8388607, %v23_v3  ;;  %v584_v32 = vmov 920167782   ;;  %v585_v39 = vmov 1326507024  }
  0x17   :  { %v489_v8 = vadd.s32 4294967169, %v27_v4  ;;  %v239_v9 = vshrl.u32 %v238_v5, 23  ;;  %v242_v10 = vand.u32 8388607, %v235_v7  ;;  %vm24_vm15 = vcmp.le.f32.partialorder %v23_v3, 0.7853982 }
  0x18   :  { %v31_v13 = vor.u32 8388608, %v30_v6  ;;  %s586_s0 = smov [#allocation5]  }
  0x19   :  { %v33_v11 = vadd.s32 1, %v489_v8  ;;  %v497_v12 = vadd.s32 4294967169, %v239_v9  ;;  %v243_v15 = vor.u32 8388608, %v242_v10  ;;  %s477_s18 = sshll.u32 %s586_s0, 4  ;;  %s478_s18 = int_to_ptr.vmem [resolvable:$true] %s477_s18 }
  0x1a   :  { %v625_v20 = vshll.u32 %v31_v13, 8  ;;  %s553_s19 = scalar_lea.vmem %s478_s18, 576  ;;  %p558_p9 = scmp.lt.s32.totalorder %s478_s18, %s478_s18 }
  0x1b   :  { %vm34_vm0 = vcmp.gt.s32.totalorder %v33_v11, 0  ;;  %v245_v14 = vadd.s32 1, %v497_v12  ;;  %v627_v25 = vshll.u32 %v243_v15, 8  ;;  %p554_p8 = scmp.ne.s32.totalorder %s478_s18, %s553_s19  ;;  %p559_p10 = scmp.lt.s32.totalorder %s553_s19, %s553_s19 }
  0x1c   :  { %v35_v16 = vsel %vm34_vm0, %v33_v11, 0  ;;  %vm237_vm0 = vcmp.lt.s32.totalorder %v616_v2, 0 }
  0x1d   :  { %v37_v17 = vand.u32 31, %v35_v16  ;;  %vm246_vm1 = vcmp.gt.s32.totalorder %v245_v14, 0  ;;  %v36_v18 = vshrl.u32 %v35_v16, 5  ;;  %p560_p11 = por %p559_p10, %p558_p9 }
  0x1e   :  { %v247_v19 = vsel %vm246_vm1, %v245_v14, 0  ;;  %vm236_vm1 = vcmp.le.f32.partialorder %v235_v7, 0.7853982 }
  0x1f   :  { %v38_v21 = vsub.s32 32, %v37_v17  ;;  %v249_v22 = vand.u32 31, %v247_v19  ;;  %v40_v24 = vshll.u32 %v580_v23, %v37_v17  ;;  %v43_v27 = vshll.u32 %v581_v26, %v37_v17  ;;  %p561_p12 = pnand %p560_p11, %p554_p8 }
  0x20   :  { %v46_v29 = vshll.u32 %v582_v28, %v37_v17  ;;  %v49_v31 = vshll.u32 %v583_v30, %v37_v17  ;;  %v52_v33 = vshll.u32 %v584_v32, %v37_v17  ;;  %vm55_vm2 = vcmp.lt.s32.totalorder %v36_v18, 1 }
  0x21   :  { %v39_v34 = vshrl.u32 %v580_v23, %v38_v21  ;;  %v41_v35 = vshrl.u32 %v581_v26, %v38_v21  ;;  %v44_v36 = vshrl.u32 %v582_v28, %v38_v21  ;;  %v47_v37 = vshrl.u32 %v583_v30, %v38_v21 }
  0x22   :  { %v50_v38 = vshrl.u32 %v584_v32, %v38_v21  ;;  %v53_v40 = vshrl.u32 %v585_v39, %v38_v21  ;;  %vm56_vm3 = vcmp.lt.s32.totalorder %v36_v18, 2  ;;  %vm57_vm4 = vcmp.lt.s32.totalorder %v36_v18, 3 }
  0x23   :  { %v42_v41 = vor.u32 %v41_v35, %v40_v24  ;;  %v45_v42 = vor.u32 %v44_v36, %v43_v27  ;;  %v48_v43 = vor.u32 %v47_v37, %v46_v29  ;;  %vm58_vm5 = vcmp.lt.s32.totalorder %v36_v18, 4 }
  0x24   :  { %v51_v44 = vor.u32 %v50_v38, %v49_v31  ;;  %v54_v45 = vor.u32 %v53_v40, %v52_v33  ;;  %v250_v46 = vsub.s32 32, %v249_v22  ;;  %v248_v51 = vshrl.u32 %v247_v19, 5 }
  0x25   :  { %v59_v47 = vsel %vm55_vm2, %v39_v34, %v42_v41  ;;  %v60_v48 = vsel %vm58_vm5, %v48_v43, 2102212464  ;;  %v63_v49 = vsel %vm55_vm2, %v42_v41, %v45_v42  ;;  %v67_v50 = vsel %vm55_vm2, %v45_v42, %v48_v43 }
  0x26   :  { %v61_v52 = vsel %vm57_vm4, %v45_v42, %v60_v48  ;;  %v64_v53 = vsel %vm58_vm5, %v51_v44, 920167782  ;;  %v68_v54 = vsel %vm58_vm5, %v54_v45, 1326507024  ;;  %v251_v57 = vshrl.u32 %v580_v23, %v250_v46 }
  0x27   :  { %v65_v55 = vsel %vm57_vm4, %v48_v43, %v64_v53  ;;  %v69_v56 = vsel %vm57_vm4, %v51_v44, %v68_v54  ;;  %v252_v58 = vshll.u32 %v580_v23, %v249_v22  ;;  %v62_v59 = vsel %vm56_vm3, %v59_v47, %v61_v52 }
  0x28   :  { %v66_v60 = vsel %vm56_vm3, %v63_v49, %v65_v55  ;;  %v70_v61 = vsel %vm56_vm3, %v67_v50, %v69_v56  ;;  %v253_v62 = vshrl.u32 %v581_v26, %v250_v46  ;;  %v255_v8 = vshll.u32 %v581_v26, %v249_v22 }
  0x29   :  { %v633_v63 = vmul.u32.u64.low %v625_v20, %v70_v61  ;;  %v634_v1 = vmul.u32.u64.high %v625_v20, %v70_v61, %v633_v63  ;;  %v637_v4 = vmul.u32.u64.low %v625_v20, %v66_v60  ;;  %v638_v5 = vmul.u32.u64.high %v625_v20, %v66_v60, %v637_v4 }
  0x2a   :  { %v254_v6 = vor.u32 %v253_v62, %v252_v58  ;;  %v256_v9 = vshrl.u32 %v582_v28, %v250_v46  ;;  %v258_v10 = vshll.u32 %v582_v28, %v249_v22  ;;  %v259_v11 = vshrl.u32 %v583_v30, %v250_v46 }
  0x2b   :  { %v261_v12 = vshll.u32 %v583_v30, %v249_v22  ;;  %v262_v13 = vshrl.u32 %v584_v32, %v250_v46  ;;  %v264_v14 = vshll.u32 %v584_v32, %v249_v22  ;;  %v78_v15 = vmul.u32 %v625_v20, %v62_v59 }
  0x2c   :  { %v257_v16 = vor.u32 %v256_v9, %v255_v8  ;;  %v265_v17 = vshrl.u32 %v585_v39, %v250_v46  ;;  %vm267_vm6 = vcmp.lt.s32.totalorder %v248_v51, 1  ;;  %vm80_vm7 = vc.u32 %v634_v1, %v637_v4 }
  0x2d   :  { %v81_v18 = vadd.s32 1, %v638_v5  ;;  %v260_v19 = vor.u32 %v259_v11, %v258_v10  ;;  %vm268_vm8 = vcmp.lt.s32.totalorder %v248_v51, 2  ;;  %v263_v21 = vor.u32 %v262_v13, %v261_v12 }
  0x2e   :  { %v266_v23 = vor.u32 %v265_v17, %v264_v14  ;;  %vm269_vm9 = vcmp.lt.s32.totalorder %v248_v51, 3  ;;  %vm270_vm10 = vcmp.lt.s32.totalorder %v248_v51, 4  ;;  %v271_v26 = vsel %vm267_vm6, %v251_v57, %v254_v6 }
  0x2f   :  { %v82_v24 = vsel %vm80_vm7, %v81_v18, %v638_v5  ;;  %v272_v22 = vsel %vm270_vm10, %v260_v19, 2102212464  ;;  %v275_v20 = vsel %vm267_vm6, %v254_v6, %v257_v16  ;;  %v276_v29 = vsel %vm270_vm10, %v263_v21, 920167782 }
  0x30   :  { %v83_v27 = vadd.s32 %v82_v24, %v78_v15  ;;  %v273_v28 = vsel %vm269_vm9, %v257_v16, %v272_v22  ;;  %v279_v30 = vsel %vm267_vm6, %v257_v16, %v260_v19  ;;  %v277_v31 = vsel %vm269_vm9, %v260_v19, %v276_v29 }
  0x31   :  { %v280_v32 = vsel %vm270_vm10, %v266_v23, 1326507024  ;;  %v278_v34 = vsel %vm268_vm8, %v275_v20, %v277_v31  ;;  %v274_v36 = vsel %vm268_vm8, %v271_v26, %v273_v28  ;;  %v79_v56 = vadd.s32 %v637_v4, %v634_v1 }
  0x32   :  { %v84_v33 = vadd.s32 536870912, %v83_v27  ;;  %v281_v35 = vsel %vm269_vm9, %v263_v21, %v280_v32  ;;  %v651_v38 = vmul.u32.u64.low %v627_v25, %v278_v34  ;;  %v652_v39 = vmul.u32.u64.high %v627_v25, %v278_v34, %v651_v38 }
  0x33   :  { %v282_v37 = vsel %vm268_vm8, %v279_v30, %v281_v35  ;;  %v290_v44 = vmul.u32 %v627_v25, %v274_v36  ;;  %vm115_vm8 = vweird.f32 %v611_v0 }
  0x34   :  { %v85_v40 = vshrl.u32 %v84_v33, 30  ;;  %v655_v41 = vmul.u32.u64.low %v627_v25, %v282_v37  ;;  %v656_v42 = vmul.u32.u64.high %v627_v25, %v282_v37, %v655_v41  ;;  %v293_v45 = vadd.s32 1, %v652_v39 }
  0x36   :  { %v86_v43 = vshll.u32 %v85_v40, 30  ;;  %vm292_vm11 = vc.u32 %v656_v42, %v651_v38  ;;  %v109_v14 = vsub.s32 4, %v85_v40  ;;  %v291_v1 = vadd.s32 %v651_v38, %v656_v42 }
  0x37   :  { %v294_v47 = vsel %vm292_vm11, %v293_v45, %v652_v39 }
  0x38   :  { %v87_v46 = vsub.s32 %v83_v27, %v86_v43  ;;  %v295_v49 = vadd.s32 %v294_v47, %v290_v44  ;;  %v110_v21 = vsel %vm25_vm14, %v109_v14, %v85_v40 }
  0x39   :  { %v112_v20 = vsel %vm24_vm15, 0, %v110_v21 }
  0x3a   :  { %v89_v48 = vsub.s32 0, %v87_v46  ;;  %v296_v51 = vadd.s32 536870912, %v295_v49  ;;  %v116_v31 = vadd.s32 3, %v112_v20  ;;  %v220_v3 = vand.u32 3, %v112_v20 }
  0x3c   :  { %v490_v50 = vmin.u32 %v89_v48, %v87_v46  ;;  %v297_v53 = vshrl.u32 %v296_v51, 30  ;;  %v117_v35 = vand.u32 3, %v116_v31  ;;  %vm225_vm3 = vcmp.eq.s32.totalorder %v220_v3, 2 }
  0x3d   :  { %vm222_vm5 = vcmp.eq.s32.totalorder %v220_v3, 0  ;;  %vm221_vm7 = vcmp.lt.s32.totalorder %v220_v3, 2 }
  0x3e   :  { %v91_v52 = vclz %v490_v50  ;;  %v298_v55 = vshll.u32 %v297_v53, 30  ;;  %v321_v33 = vsub.s32 4, %v297_v53  ;;  %vm122_vm2 = vcmp.eq.s32.totalorder %v117_v35, 2 }
  0x3f   :  { %vm119_vm4 = vcmp.eq.s32.totalorder %v117_v35, 0  ;;  %vm118_vm6 = vcmp.lt.s32.totalorder %v117_v35, 2 }
  0x40   :  { %v491_v54 = vadd.s32 4294967294, %v91_v52  ;;  %v299_v25 = vsub.s32 %v295_v49, %v298_v55  ;;  %v322_v37 = vsel %vm237_vm0, %v321_v33, %v297_v53 }
  0x41   :  { %v324_v41 = vsel %vm236_vm1, 0, %v322_v37 }
  0x42   :  { %vm492_vm12 = vcmp.lt.s32.totalorder %v491_v54, 0  ;;  %v301_v61 = vsub.s32 0, %v299_v25  ;;  %v328_v45 = vadd.s32 3, %v324_v41 }
  0x43   :  { %v94_v57 = vsel %vm492_vm12, 0, %v491_v54  ;;  %v432_v54 = vand.u32 3, %v324_v41 }
  0x44   :  { %v95_v58 = vsub.s32 32, %v94_v57  ;;  %v96_v59 = vshll.u32 %v87_v46, %v94_v57  ;;  %v99_v60 = vsub.s32 4294967266, %v94_v57  ;;  %v498_v5 = vmin.u32 %v301_v61, %v299_v25 }
  0x45   :  { %v329_v53 = vand.u32 3, %v328_v45  ;;  %vm437_vm10 = vcmp.eq.s32.totalorder %v432_v54, 2  ;;  %vm434_vm12 = vcmp.eq.s32.totalorder %v432_v54, 0 }
  0x46   :  { %v97_v62 = vshrl.u32 %v79_v56, %v95_v58  ;;  %v100_v63 = vadd.s32 127, %v99_v60  ;;  %v303_v9 = vclz %v498_v5 }
  0x47   :  { %vm334_vm9 = vcmp.eq.s32.totalorder %v329_v53, 2  ;;  %vm331_vm11 = vcmp.eq.s32.totalorder %v329_v53, 0 }
  0x48   :  { %v98_v6 = vor.u32 %v97_v62, %v96_v59  ;;  %v101_v8 = vshll.u32 %v100_v63, 23  ;;  %v499_v12 = vadd.s32 4294967294, %v303_v9 }
  0x4a   :  { %v102_v10 = vor.u32 4788187, %v101_v8  ;;  %v105_v11 = vcvt.s32.f32 %v98_v6  ;;  %vm500_vm13 = vcmp.lt.s32.totalorder %v499_v12, 0 }
  0x4b   :  { %v306_v15 = vsel %vm500_vm13, 0, %v499_v12  ;;  %vm330_vm13 = vcmp.lt.s32.totalorder %v329_v53, 2 }
  0x4c   :  { %v103_v13 = vand.u32 2147483647, %v102_v10  ;;  %v307_v16 = vsub.s32 32, %v306_v15  ;;  %v308_v17 = vshll.u32 %v299_v25, %v306_v15  ;;  %v311_v18 = vsub.s32 4294967266, %v306_v15 }
  0x4e   :  { %v106_v4 = vmul.f32 %v105_v11, %v103_v13  ;;  %v309_v23 = vshrl.u32 %v291_v1, %v307_v16  ;;  %v312_v24 = vadd.s32 127, %v311_v18 }
  0x50   :  { %v107_v19 = vxor.u32 2147483648, %v106_v4  ;;  %v310_v27 = vor.u32 %v309_v23, %v308_v17  ;;  %v313_v28 = vshll.u32 %v312_v24, 23 }
  0x52   :  { %v108_v26 = vsel %vm25_vm14, %v107_v19, %v106_v4  ;;  %v314_v29 = vor.u32 4788187, %v313_v28  ;;  %v317_v30 = vcvt.s32.f32 %v310_v27  ;;  %vm433_vm14 = vcmp.lt.s32.totalorder %v432_v54, 2 }
  0x53   :  { %v111_v22 = vsel %vm24_vm15, %v611_v0, %v108_v26  ;;  %vm327_vm15 = vweird.f32 %v616_v2 }
  0x54   :  { %523 = vcosq.f32 %v111_v22  ;;  %v315_v32 = vand.u32 2147483647, %v314_v29 }
  0x55   :  { %525 = vsinq.f32 %v111_v22 }
  0x56   :  { %v318_v34 = vmul.f32 %v317_v30, %v315_v32 }
  0x58   :  { %v319_v36 = vxor.u32 2147483648, %v318_v34 }
  0x5a   :  { %v320_v38 = vsel %vm237_vm0, %v319_v36, %v318_v34 }
  0x5b   :  { %v323_v40 = vsel %vm236_vm1, %v616_v2, %v320_v38 }
  0x5c   :  { %527 = vcosq.f32 %v323_v40 }
  0x5d   :  { %529 = vsinq.f32 %v323_v40 }
  0x5e   :  { %v524_v39 = vpop.eup %523 }
  0x5f   :  { %v526_v42 = vpop.eup %525  ;;  %v123_v43 = vxor.u32 2147483648, %v524_v39 }
  0x60   :  { %v120_v44 = vxor.u32 2147483648, %v526_v42 }
  0x61   :  { %v124_v7 = vsel %vm122_vm2, %v123_v43, %v526_v42  ;;  %v227_v46 = vsel %vm225_vm3, %v123_v43, %v526_v42 }
  0x62   :  { %v121_v47 = vsel %vm119_vm4, %v524_v39, %v120_v44  ;;  %v224_v48 = vsel %vm222_vm5, %v524_v39, %v120_v44 }
  0x63   :  { %v125_v49 = vsel %vm118_vm6, %v121_v47, %v124_v7  ;;  %v228_v50 = vsel %vm221_vm7, %v224_v48, %v227_v46 }
  0x64   :  { %v126_v51 = vsel %vm115_vm8, nan, %v125_v49  ;;  %v229_v52 = vsel %vm115_vm8, nan, %v228_v50 }
  0x65   :  { %231 = vst [vmem:[#allocation5 + $0x4] sm:$0x7] %v126_v51  ;;  %233 = vst [vmem:[#allocation5 + $0x8] sm:$0x7] %v229_v52 }
  0x66   :  { %v528_v55 = vpop.eup %527 }
  0x67   :  { %v530_v56 = vpop.eup %529  ;;  %v335_v57 = vxor.u32 2147483648, %v528_v55 }
  0x68   :  { %v332_v0 = vxor.u32 2147483648, %v530_v56 }
  0x69   :  { %v336_v25 = vsel %vm334_vm9, %v335_v57, %v530_v56  ;;  %v439_v58 = vsel %vm437_vm10, %v335_v57, %v530_v56 }
  0x6a   :  { %v333_v59 = vsel %vm331_vm11, %v528_v55, %v332_v0  ;;  %v436_v60 = vsel %vm434_vm12, %v528_v55, %v332_v0 }
  0x6b   :  { %v337_v61 = vsel %vm330_vm13, %v333_v59, %v336_v25  ;;  %v440_v62 = vsel %vm433_vm14, %v436_v60, %v439_v58 }
  0x6c   :  { %v338_v63 = vsel %vm327_vm15, nan, %v337_v61  ;;  %v441_v5 = vsel %vm327_vm15, nan, %v440_v62 }
  0x6d   :  { %v442_v6 = vmul.f32 %v441_v5, %v126_v51  ;;  %v446_v8 = vmul.f32 %v338_v63, %v126_v51  ;;  %v443_v9 = vmul.f32 %v338_v63, %v229_v52  ;;  %v445_v10 = vmul.f32 %v441_v5, %v229_v52 }
  0x6f   :  { %v444_v11 = vadd.f32 %v443_v9, %v442_v6  ;;  %v447_v12 = vsub.f32 %v445_v10, %v446_v8 }
  0x71   :  { %449 = vst [vmem:[#allocation5 + $0xc] sm:$0x7] %v444_v11  ;;  %451 = vst [vmem:[#allocation5 + $0x10] sm:$0x7] %v447_v12  ;;  %v452_v13 = vmul.f32 %v444_v11, %v441_v5  ;;  %v453_v14 = vmul.f32 %v447_v12, %v338_v63  ;;  %v455_v1 = vmul.f32 %v447_v12, %v441_v5 }
  0x72   :  { %v456_v2 = vmul.f32 %v444_v11, %v338_v63 }
  0x73   :  { %v454_v4 = vadd.f32 %v453_v14, %v452_v13 }
  0x74   :  { %v457_v15 = vsub.f32 %v455_v1, %v456_v2 }
  0x75   :  { %459 = vst [vmem:[#allocation5 + $0x14] sm:$0x7] %v454_v4  ;;  %v462_v16 = vmul.f32 %v454_v4, %v441_v5  ;;  %v466_v19 = vmul.f32 %v454_v4, %v338_v63 }
  0x76   :  { %461 = vst [vmem:[#allocation5 + $0x18] sm:$0x7] %v457_v15  ;;  %v463_v17 = vmul.f32 %v457_v15, %v338_v63  ;;  %v465_v18 = vmul.f32 %v457_v15, %v441_v5 }
  0x78   :  { %v464_v21 = vadd.f32 %v463_v17, %v462_v16  ;;  %v467_v23 = vsub.f32 %v465_v18, %v466_v19 }
  0x7a   :  { %469 = vst [vmem:[#allocation5 + $0x1c] sm:$0x7] %v464_v21  ;;  %471 = vst [vmem:[#allocation5 + $0x20] sm:$0x7] %v467_v23 }
  0x7b   :  { %564 = shalt.err (!%p561_p12)
}
  0x7c   :  { %s565_s22 = scalar_lea.hbm %s687_s1, 576 }
  0x7d   :  { %p566_p13 = scmp.ne.s32.totalorder %s687_s1, %s565_s22  ;;  %p569_p0 = scmp.lt.u32.totalorder %s565_s22, %s687_s1 }
  0x7f   :  { %p571_p1 = pnand %p569_p0, %p566_p13 }
  0x81   :  { %574 = shalt.err (!%p571_p1)
}
  0x82   :  { %s587_s27 = smov 64   ;;  %s588_s28 = smov 4  }
  0x83   :  { %483 = dma.vmem_to_hbm [thread:$0]  %s478_s18, 576, %s687_s1, [#allocation4], %s587_s27, %s587_s27, %s588_s28  }
  0x84   :  { %577 = dma.done.wait [#allocation4], 576  }
  0x85   :  { %578 = vsyncadd [#allocation4], 4294966720 }
  0x86   :  { %487 = vsyncpa [#allocation3], 1 }
  0x87   :  { %488 = vsyncpa [#allocation4], 1 }

</bundles_post_ra>
